<compile_context>
chip_gen: v5e
topology: v5e:2x2
jax: 0.10.0
libtpu: 0.0.40
codegen_flags: <defaults>
</compile_context>

<pallas_src>
import numpy as np
import jax
import jax.numpy as jnp
from jax.experimental import pallas as pl
from jax.experimental.pallas import tpu as pltpu


LANE = 128      # lane width (last-dim granularity)
SUBLANE = 8     # f32 sublane height (second-to-last dim granularity)
MAX_TM = 1024   # batch tile cap: mem-bound op, biggest tile that fits VMEM


def _round_up(x, m):
    return ((x + m - 1) // m) * m


# ---------------------------------------------------------------------------
# Deterministic parameter init, matching torch layer_init semantics:
#   orthogonal_(weight, gain=sqrt(2)); constant_(bias, 0.0)
# ---------------------------------------------------------------------------
def orthogonal_init(key, rows, cols, gain):
    a = jax.random.normal(key, (max(rows, cols), min(rows, cols)), dtype=jnp.float32)
    q, r = jnp.linalg.qr(a)
    q = q * jnp.sign(jnp.diag(r))
    if rows < cols:
        q = q.T
    return (gain * q[:rows, :cols]).astype(jnp.float32)


# ---------------------------------------------------------------------------
# One-time parameter preparation (hoisted out of the forward path)
# ---------------------------------------------------------------------------
def prepare_params(weight, bias):
    """weight: torch layout (num_meta_options, hidden_dim); bias: (num_meta_options,).

    Returns a lane-dense, pre-transposed weight (H_pad, O_pad) and a (1, O_pad)
    bias, both zero-padded.  Done once at init so each forward call does no
    weight-side padding / reshaping.
    """
    O, H = weight.shape
    H_pad = _round_up(H, LANE)
    O_pad = _round_up(O, LANE)
    w_t = weight.T                                              # (H, O)
    w_padded = jnp.pad(w_t, ((0, H_pad - H), (0, O_pad - O)))   # (H_pad, O_pad)
    bias_padded = jnp.pad(bias, ((0, O_pad - O),)).reshape(1, O_pad)
    return w_padded, bias_padded


# ---------------------------------------------------------------------------
# Pallas kernel: fused matmul + bias (the entire MetaOptionActor forward)
# ---------------------------------------------------------------------------
def actor_fc_kernel(x_ref, w_ref, b_ref, o_ref):
    # x_ref: (TM, H_pad)  w_ref: (H_pad, O_pad)  b_ref: (1, O_pad)  o_ref: (TM, O_pad)
    acc = jnp.dot(x_ref[...], w_ref[...], preferred_element_type=jnp.float32)
    o_ref[...] = (acc + b_ref[...]).astype(o_ref.dtype)


def meta_option_actor_forward(state_rep, w_padded, bias_padded, num_meta_options,
                              use_bf16=False):
    """state_rep: (B, H) f32; w_padded: (H_pad, O_pad) f32; bias_padded: (1, O_pad) f32.

    Returns logits (B, num_meta_options) f32.
    """
    B, H = state_rep.shape
    H_pad, O_pad = w_padded.shape
    assert H <= H_pad

    # Batch tile: sublane-aligned, as big as reasonable (mem-bound op).
    TM = min(_round_up(B, SUBLANE), MAX_TM)
    # v7x has 2 TensorCores: give the "parallel" batch axis >= 2 grid steps
    # when the batch is large enough that halving the tile still amortizes the
    # ~0.35us/step overhead.  (On v5e/v6e one big step stays optimal for tiny B.)
    if _round_up(B, TM) // TM < 2 and TM >= 256:
        TM = _round_up(TM // 2, SUBLANE)
    B_pad = _round_up(B, TM)

    # Activation padding (zero rows/cols contribute nothing to the dot).
    x_p = state_rep
    if B_pad != B or H_pad != H:
        x_p = jnp.pad(x_p, ((0, B_pad - B), (0, H_pad - H)))

    if use_bf16:
        # Halve HBM bytes of the two big operands; accumulate stays f32.
        x_p = x_p.astype(jnp.bfloat16)
        w_p = w_padded.astype(jnp.bfloat16)
    else:
        w_p = w_padded

    grid = (B_pad // TM,)

    def run(single_buffer_consts):
        if single_buffer_consts:
            # Weight/bias never change across grid steps: single-buffer them.
            const_kwargs = dict(pipeline_mode=pl.Buffered(1))
        else:
            const_kwargs = {}
        return pl.pallas_call(
            actor_fc_kernel,
            out_shape=jax.ShapeDtypeStruct((B_pad, O_pad), jnp.float32),
            grid=grid,
            in_specs=[
                # x: one batch tile per grid step
                pl.BlockSpec((TM, H_pad), lambda i: (i, 0)),
                # weight / bias: constant index_map -> VMEM-resident across tiles
                pl.BlockSpec((H_pad, O_pad), lambda i: (0, 0), **const_kwargs),
                pl.BlockSpec((1, O_pad), lambda i: (0, 0), **const_kwargs),
            ],
            out_specs=pl.BlockSpec((TM, O_pad), lambda i: (i, 0)),
            compiler_params=pltpu.CompilerParams(
                # No reduction grid axis; batch tiles are independent ->
                # "parallel" lets v7x shard the grid across its two TCs.
                dimension_semantics=("parallel",),
            ),
        )(x_p, w_p, bias_padded)

    try:
        out_padded = run(single_buffer_consts=True)
    except Exception:
        # Older JAX without BlockSpec pipeline_mode / Buffered(1): fall back
        # to default double-buffering (correctness identical).
        out_padded = run(single_buffer_consts=False)

    # TODO(synk): downstream consumers could take the lane-padded (B_pad, O_pad)
    # slab directly (mask padded logits) and skip this slice-copy.
    return out_padded[:B, :num_meta_options]


# ---------------------------------------------------------------------------
# Pure-JAX reference for correctness check
# ---------------------------------------------------------------------------
def meta_option_actor_ref(state_rep, weight, bias):
    return state_rep @ weight.T + bias[None, :]


if __name__ == "__main__":
    # Small shapes consistent with the module's forward:
    #   state_rep: (batch, hidden_dim) -> logits: (batch, num_meta_options)
    batch = 2
    hidden_dim = 32
    num_meta_options = 8
    input_channels = 4  # unused by MetaOptionActor.forward (only fc2 is defined)

    key = jax.random.PRNGKey(0)
    k_x, k_w = jax.random.split(key)

    # torch Linear weight layout: (num_meta_options, hidden_dim); bias zeros.
    weight = orthogonal_init(k_w, num_meta_options, hidden_dim, gain=float(np.sqrt(2)))
    bias = jnp.zeros((num_meta_options,), dtype=jnp.float32)

    # Lane-dense padding / transpose done ONCE at init.
    w_padded, bias_padded = prepare_params(weight, bias)

    state_rep = jax.random.normal(k_x, (batch, hidden_dim), dtype=jnp.float32)

    # f32 path
    out = meta_option_actor_forward(state_rep, w_padded, bias_padded, num_meta_options)
    out = jax.block_until_ready(out)
    ref = meta_option_actor_ref(state_rep, weight, bias)
    np.testing.assert_allclose(np.asarray(out), np.asarray(ref), rtol=1e-5, atol=1e-5)

    # bf16-input / f32-accumulate path (mem-bound: halves operand HBM bytes).
    out_bf16 = meta_option_actor_forward(state_rep, w_padded, bias_padded,
                                         num_meta_options, use_bf16=True)
    out_bf16 = jax.block_until_ready(out_bf16)
    np.testing.assert_allclose(np.asarray(out_bf16), np.asarray(ref),
                               rtol=5e-2, atol=5e-2)

    print("KERNEL_OK")
</pallas_src>

<mosaic_0001>
module attributes {stable_mosaic.version = 11 : i64} {
  func.func @actor_fc_kernel(%arg0: i32, %arg1: memref<8x128xf32, #tpu.memory_space<vmem>>, %arg2: memref<128x128xf32, #tpu.memory_space<vmem>>, %arg3: memref<1x128xf32, #tpu.memory_space<vmem>>, %arg4: memref<8x128xf32, #tpu.memory_space<vmem>>) attributes {dimension_semantics = [#tpu.dimension_semantics<parallel>], iteration_bounds = array<i64: 1>, scalar_prefetch = 0 : i64, scratch_operands = 0 : i64, tpu.core_type = #tpu.core_type<tc>, window_params = [{transform_indices = @transform_0, window_bounds = array<i64: 8, 128>}, {pipeline_mode = #tpu.pipeline_mode<synchronous>, transform_indices = @transform_1, window_bounds = array<i64: 128, 128>}, {pipeline_mode = #tpu.pipeline_mode<synchronous>, transform_indices = @transform_2, window_bounds = array<i64: 1, 128>}, {transform_indices = @transform_3, window_bounds = array<i64: 8, 128>}]} {
    %c0 = arith.constant 0 : index
    %c0_0 = arith.constant 0 : index
    %0 = vector.load %arg1[%c0, %c0_0] : memref<8x128xf32, #tpu.memory_space<vmem>>, vector<8x128xf32>
    %c0_1 = arith.constant 0 : index
    %c0_2 = arith.constant 0 : index
    %1 = vector.load %arg2[%c0_1, %c0_2] : memref<128x128xf32, #tpu.memory_space<vmem>>, vector<128x128xf32>
    %cst = arith.constant dense<0.000000e+00> : vector<8x128xf32>
    %2 = tpu.matmul %0, %1, %cst {dimension_numbers = #tpu.dot_dimension_numbers<[1], [0], [0], [1], [0, 0, 1, 1], [], []>} : vector<8x128xf32>, vector<128x128xf32>, vector<8x128xf32> -> vector<8x128xf32>
    %c0_3 = arith.constant 0 : index
    %c0_4 = arith.constant 0 : index
    %3 = vector.load %arg3[%c0_3, %c0_4] : memref<1x128xf32, #tpu.memory_space<vmem>>, vector<1x128xf32>
    %4 = vector.broadcast %3 : vector<1x128xf32> to vector<8x128xf32>
    %5 = arith.addf %2, %4 : vector<8x128xf32>
    %c0_5 = arith.constant 0 : index
    %c0_6 = arith.constant 0 : index
    %6 = vector.load %arg4[%c0_5, %c0_6] : memref<8x128xf32, #tpu.memory_space<vmem>>, vector<8x128xf32>
    tpu.vector_store %arg4[%c0_5, %c0_6], %5 {strides = array<i32>} : memref<8x128xf32, #tpu.memory_space<vmem>>, vector<8x128xf32>,
    return
  }
  func.func @transform_0(%arg0: i32) -> (i32, i32) {
    %c0_i32 = arith.constant 0 : i32
    %c0_i32_0 = arith.constant 0 : i32
    return %arg0, %c0_i32 : i32, i32
  }
  func.func @transform_1(%arg0: i32) -> (i32, i32) {
    %c0_i32 = arith.constant 0 : i32
    %c0_i32_0 = arith.constant 0 : i32
    %c0_i32_1 = arith.constant 0 : i32
    return %c0_i32, %c0_i32_0 : i32, i32
  }
  func.func @transform_2(%arg0: i32) -> (i32, i32) {
    %c0_i32 = arith.constant 0 : i32
    %c0_i32_0 = arith.constant 0 : i32
    %c0_i32_1 = arith.constant 0 : i32
    return %c0_i32, %c0_i32_0 : i32, i32
  }
  func.func @transform_3(%arg0: i32) -> (i32, i32) {
    %c0_i32 = arith.constant 0 : i32
    %c0_i32_0 = arith.constant 0 : i32
    return %arg0, %c0_i32 : i32, i32
  }
}

module attributes {stable_mosaic.version = 11 : i64} {
  func.func @actor_fc_kernel(%arg0: i32, %arg1: memref<8x128xf32, #tpu.memory_space<vmem>>, %arg2: memref<128x128xf32, #tpu.memory_space<vmem>>, %arg3: memref<1x128xf32, #tpu.memory_space<vmem>>, %arg4: memref<8x128xf32, #tpu.memory_space<vmem>>) attributes {dimension_semantics = [#tpu.dimension_semantics<parallel>], iteration_bounds = array<i64: 1>, scalar_prefetch = 0 : i64, scratch_operands = 0 : i64, tpu.core_type = #tpu.core_type<tc>, window_params = [{transform_indices = @transform_0, window_bounds = array<i64: 8, 128>}, {pipeline_mode = #tpu.pipeline_mode<synchronous>, transform_indices = @transform_1, window_bounds = array<i64: 128, 128>}, {pipeline_mode = #tpu.pipeline_mode<synchronous>, transform_indices = @transform_2, window_bounds = array<i64: 1, 128>}, {transform_indices = @transform_3, window_bounds = array<i64: 8, 128>}]} {
    %c0 = arith.constant 0 : index
    %c0_0 = arith.constant 0 : index
    %0 = vector.load %arg1[%c0, %c0_0] : memref<8x128xf32, #tpu.memory_space<vmem>>, vector<8x128xf32>
    %c0_1 = arith.constant 0 : index
    %c0_2 = arith.constant 0 : index
    %1 = vector.load %arg2[%c0_1, %c0_2] : memref<128x128xf32, #tpu.memory_space<vmem>>, vector<128x128xf32>
    %cst = arith.constant dense<0.000000e+00> : vector<8x128xf32>
    %2 = tpu.matmul %0, %1, %cst {dimension_numbers = #tpu.dot_dimension_numbers<[1], [0], [0], [1], [0, 0, 1, 1], [], []>} : vector<8x128xf32>, vector<128x128xf32>, vector<8x128xf32> -> vector<8x128xf32>
    %c0_3 = arith.constant 0 : index
    %c0_4 = arith.constant 0 : index
    %3 = vector.load %arg3[%c0_3, %c0_4] : memref<1x128xf32, #tpu.memory_space<vmem>>, vector<1x128xf32>
    %4 = vector.broadcast %3 : vector<1x128xf32> to vector<8x128xf32>
    %5 = arith.addf %2, %4 : vector<8x128xf32>
    %c0_5 = arith.constant 0 : index
    %c0_6 = arith.constant 0 : index
    %6 = vector.load %arg4[%c0_5, %c0_6] : memref<8x128xf32, #tpu.memory_space<vmem>>, vector<8x128xf32>
    tpu.vector_store %arg4[%c0_5, %c0_6], %5 {strides = array<i32>} : memref<8x128xf32, #tpu.memory_space<vmem>>, vector<8x128xf32>,
    return
  }
  func.func @transform_0(%arg0: i32) -> (i32, i32) {
    %c0_i32 = arith.constant 0 : i32
    %c0_i32_0 = arith.constant 0 : i32
    return %arg0, %c0_i32 : i32, i32
  }
  func.func @transform_1(%arg0: i32) -> (i32, i32) {
    %c0_i32 = arith.constant 0 : i32
    %c0_i32_0 = arith.constant 0 : i32
    %c0_i32_1 = arith.constant 0 : i32
    return %c0_i32, %c0_i32_0 : i32, i32
  }
  func.func @transform_2(%arg0: i32) -> (i32, i32) {
    %c0_i32 = arith.constant 0 : i32
    %c0_i32_0 = arith.constant 0 : i32
    %c0_i32_1 = arith.constant 0 : i32
    return %c0_i32, %c0_i32_0 : i32, i32
  }
  func.func @transform_3(%arg0: i32) -> (i32, i32) {
    %c0_i32 = arith.constant 0 : i32
    %c0_i32_0 = arith.constant 0 : i32
    return %arg0, %c0_i32 : i32, i32
  }
}

</mosaic_0001>

<bundles_post_ra>
// kernel: tpu_custom_call.1
= control target key start
LH: loop header
LB: loop body
LE: loop exit
PB: predicated region body
PF: predicated region fallthrough
CT: control target
= control target key end

     0   :  { %8 = vsyncpa [#allocation3], 0  ;;  %s226_s0 = inlined_call_operand.hbm [shape: f32[8,128], index: 0, kind: input, shape index: {}]   ;;  %s227_s1 = inlined_call_operand.hbm [shape: f32[128,128], index: 1, kind: input, shape index: {}]   ;;  %s228_s2 = inlined_call_operand.vmem [shape: f32[1,128], index: 2, kind: input, shape index: {}]   ;;  %s229_s3 = inlined_call_operand.hbm [shape: f32[8,128], index: 3, kind: output, shape index: {}]  }
   0x1   :  { %9 = vsyncpa [#allocation6], 0 }
   0x2   :  { %10 = vsyncpa [#allocation4], 0  ;;  %s16_s14 = sshll.u32 %s226_s0, 4  ;;  %s189_s15 = smov [#allocation2]   ;;  %s17_s14 = int_to_ptr.hbm [resolvable:$true] %s16_s14 }
   0x3   :  { %s18_s16 = sshll.u32 %s189_s15, 4  ;;  %s26_s19 = sshll.u32 %s227_s1, 4  ;;  %s19_s16 = int_to_ptr.vmem [resolvable:$true] %s18_s16  ;;  %s27_s19 = int_to_ptr.hbm [resolvable:$true] %s26_s19 }
   0x4   :  { %21 = dma.hbm_to_vmem [thread:$0]  %s17_s14, 128, %s19_s16, [#allocation3]  }
   0x5   :  { %s190_s20 = smov [#allocation5]   ;;  %s191_s22 = smov 128  }
   0x6   :  { %s28_s21 = sshll.u32 %s190_s20, 4  ;;  %s192_s23 = smov 8   ;;  %s29_s21 = int_to_ptr.vmem [resolvable:$true] %s28_s21 }
   0x7   :  { %34 = dma.hbm_to_vmem [thread:$0]  %s27_s19, 2048, %s29_s21, [#allocation6], %s191_s22, %s191_s22, %s192_s23  }
   0x8   :  { %183 = dma.done.wait [#allocation3], 128  }
   0x9   :  { %184 = vsyncadd [#allocation3], 4294967168 }
   0xa   :  { %185 = dma.done.wait [#allocation6], 2048  }
   0xb   :  { %186 = vsyncadd [#allocation6], 4294965248  ;;  %v61_v0 = vld [vmem:[#allocation5 + $0x78] sm:$0xff]  ;;  %v60_v1 = vld [vmem:[#allocation5 + $0x70] sm:$0xff]  ;;  %s193_s24 = smov [#allocation7]   ;;  %s94_s28 = sshll.u32 %s229_s3, 4  ;;  %s95_s28 = int_to_ptr.hbm [resolvable:$true] %s94_s28 }
   0xc   :  { %66 = vmatpush.msra.mxu0 %v61_v0  ;;  %v59_v2 = vld [vmem:[#allocation5 + $0x68] sm:$0xff]  ;;  %v58_v3 = vld [vmem:[#allocation5 + $0x60] sm:$0xff]  ;;  %v57_v4 = vld [vmem:[#allocation5 + $0x58] sm:$0xff]  ;;  %s92_s25 = sshll.u32 %s193_s24, 4  ;;  %s93_s25 = int_to_ptr.vmem [resolvable:$true] %s92_s25 }
   0xd   :  { %v56_v5 = vld [vmem:[#allocation5 + $0x50] sm:$0xff]  ;;  %v55_v6 = vld [vmem:[#allocation5 + $0x48] sm:$0xff]  ;;  %v54_v7 = vld [vmem:[#allocation5 + $0x40] sm:$0xff] }
   0xe   :  { %67 = vmatpush.msra.mxu0 %v60_v1  ;;  %v53_v8 = vld [vmem:[#allocation5 + $0x38] sm:$0xff]  ;;  %v52_v9 = vld [vmem:[#allocation5 + $0x30] sm:$0xff]  ;;  %v51_v10 = vld [vmem:[#allocation5 + $0x28] sm:$0xff] }
   0xf   :  { %v50_v11 = vld [vmem:[#allocation5 + $0x20] sm:$0xff]  ;;  %v49_v12 = vld [vmem:[#allocation5 + $0x18] sm:$0xff]  ;;  %v48_v13 = vld [vmem:[#allocation5 + $0x10] sm:$0xff] }
  0x10   :  { %68 = vmatpush.msra.mxu0 %v59_v2  ;;  %v47_v14 = vld [vmem:[#allocation5 + $0x8] sm:$0xff]  ;;  %v46_v15 = vld [vmem:[#allocation5] sm:$0xff]  ;;  %v45_v16 = vld [vmem:[#allocation2] sm:$0xff] }
  0x11   :  { %v110_v17 = vld [vmem:[%s228_s2] ss:$0 sm:$0xff] }
  0x12   :  { %69 = vmatpush.msra.mxu0 %v58_v3 }
  0x14   :  { %70 = vmatpush.msra.mxu0 %v57_v4 }
  0x16   :  { %71 = vmatpush.msra.mxu0 %v56_v5 }
  0x18   :  { %72 = vmatpush.msra.mxu0 %v55_v6 }
  0x1a   :  { %73 = vmatpush.msra.mxu0 %v54_v7 }
  0x1c   :  { %74 = vmatpush.msra.mxu0 %v53_v8 }
  0x1e   :  { %75 = vmatpush.msra.mxu0 %v52_v9 }
  0x20   :  { %76 = vmatpush.msra.mxu0 %v51_v10 }
  0x22   :  { %77 = vmatpush.msra.mxu0 %v50_v11 }
  0x24   :  { %78 = vmatpush.msra.mxu0 %v49_v12 }
  0x26   :  { %79 = vmatpush.msra.mxu0 %v48_v13 }
  0x28   :  { %80 = vmatpush.msra.mxu0 %v47_v14 }
  0x2a   :  { %81 = vmatpush.msra.mxu0 %v46_v15 }
  0x2b   :  { %82 = vmatmul.f32.vlgmr.msra.gmra.mxu0 %v45_v16 }
  0xa8   :  { %v83_v18 = vpop.f32.mrf.mxu0 }
  0xa9   :  { %v84_v19 = vadd.f32 %v110_v17, %v83_v18 }
  0xab   :  { %86 = vst [vmem:[#allocation7] sm:$0xff] %v84_v19 }
  0xac   :  { %97 = dma.vmem_to_hbm [thread:$0]  %s93_s25, 128, %s95_s28, [#allocation4]  }
  0xad   :  { %187 = dma.done.wait [#allocation4], 128  }
  0xae   :  { %188 = vsyncadd [#allocation4], 4294967168 }
  0xaf   :  { %102 = vsyncpa [#allocation3], 1 }
  0xb0   :  { %103 = vsyncpa [#allocation6], 1 }
  0xb1   :  { %104 = vsyncpa [#allocation4], 1 }

// kernel: tpu_custom_call.1
= control target key start
LH: loop header
LB: loop body
LE: loop exit
PB: predicated region body
PF: predicated region fallthrough
CT: control target
= control target key end

     0   :  { %8 = vsyncpa [#allocation3], 0  ;;  %s226_s0 = inlined_call_operand.hbm [shape: f32[8,128], index: 0, kind: input, shape index: {}]   ;;  %s227_s1 = inlined_call_operand.hbm [shape: f32[128,128], index: 1, kind: input, shape index: {}]   ;;  %s228_s2 = inlined_call_operand.vmem [shape: f32[1,128], index: 2, kind: input, shape index: {}]   ;;  %s229_s3 = inlined_call_operand.hbm [shape: f32[8,128], index: 3, kind: output, shape index: {}]  }
   0x1   :  { %9 = vsyncpa [#allocation6], 0 }
   0x2   :  { %10 = vsyncpa [#allocation4], 0  ;;  %s16_s14 = sshll.u32 %s226_s0, 4  ;;  %s189_s15 = smov [#allocation2]   ;;  %s17_s14 = int_to_ptr.hbm [resolvable:$true] %s16_s14 }
   0x3   :  { %s18_s16 = sshll.u32 %s189_s15, 4  ;;  %s26_s19 = sshll.u32 %s227_s1, 4  ;;  %s19_s16 = int_to_ptr.vmem [resolvable:$true] %s18_s16  ;;  %s27_s19 = int_to_ptr.hbm [resolvable:$true] %s26_s19 }
   0x4   :  { %21 = dma.hbm_to_vmem [thread:$0]  %s17_s14, 128, %s19_s16, [#allocation3]  }
   0x5   :  { %s190_s20 = smov [#allocation5]   ;;  %s191_s22 = smov 128  }
   0x6   :  { %s28_s21 = sshll.u32 %s190_s20, 4  ;;  %s192_s23 = smov 8   ;;  %s29_s21 = int_to_ptr.vmem [resolvable:$true] %s28_s21 }
   0x7   :  { %34 = dma.hbm_to_vmem [thread:$0]  %s27_s19, 2048, %s29_s21, [#allocation6], %s191_s22, %s191_s22, %s192_s23  }
   0x8   :  { %183 = dma.done.wait [#allocation3], 128  }
   0x9   :  { %184 = vsyncadd [#allocation3], 4294967168 }
   0xa   :  { %185 = dma.done.wait [#allocation6], 2048  }
   0xb   :  { %186 = vsyncadd [#allocation6], 4294965248  ;;  %v61_v0 = vld [vmem:[#allocation5 + $0x78] sm:$0xff]  ;;  %v60_v1 = vld [vmem:[#allocation5 + $0x70] sm:$0xff]  ;;  %s193_s24 = smov [#allocation7]   ;;  %s94_s28 = sshll.u32 %s229_s3, 4  ;;  %s95_s28 = int_to_ptr.hbm [resolvable:$true] %s94_s28 }
   0xc   :  { %66 = vmatpush.msra.mxu0 %v61_v0  ;;  %v59_v2 = vld [vmem:[#allocation5 + $0x68] sm:$0xff]  ;;  %v58_v3 = vld [vmem:[#allocation5 + $0x60] sm:$0xff]  ;;  %v57_v4 = vld [vmem:[#allocation5 + $0x58] sm:$0xff]  ;;  %s92_s25 = sshll.u32 %s193_s24, 4  ;;  %s93_s25 = int_to_ptr.vmem [resolvable:$true] %s92_s25 }
   0xd   :  { %v56_v5 = vld [vmem:[#allocation5 + $0x50] sm:$0xff]  ;;  %v55_v6 = vld [vmem:[#allocation5 + $0x48] sm:$0xff]  ;;  %v54_v7 = vld [vmem:[#allocation5 + $0x40] sm:$0xff] }
   0xe   :  { %67 = vmatpush.msra.mxu0 %v60_v1  ;;  %v53_v8 = vld [vmem:[#allocation5 + $0x38] sm:$0xff]  ;;  %v52_v9 = vld [vmem:[#allocation5 + $0x30] sm:$0xff]  ;;  %v51_v10 = vld [vmem:[#allocation5 + $0x28] sm:$0xff] }
   0xf   :  { %v50_v11 = vld [vmem:[#allocation5 + $0x20] sm:$0xff]  ;;  %v49_v12 = vld [vmem:[#allocation5 + $0x18] sm:$0xff]  ;;  %v48_v13 = vld [vmem:[#allocation5 + $0x10] sm:$0xff] }
  0x10   :  { %68 = vmatpush.msra.mxu0 %v59_v2  ;;  %v47_v14 = vld [vmem:[#allocation5 + $0x8] sm:$0xff]  ;;  %v46_v15 = vld [vmem:[#allocation5] sm:$0xff]  ;;  %v45_v16 = vld [vmem:[#allocation2] sm:$0xff] }
  0x11   :  { %v110_v17 = vld [vmem:[%s228_s2] ss:$0 sm:$0xff] }
  0x12   :  { %69 = vmatpush.msra.mxu0 %v58_v3 }
  0x14   :  { %70 = vmatpush.msra.mxu0 %v57_v4 }
  0x16   :  { %71 = vmatpush.msra.mxu0 %v56_v5 }
  0x18   :  { %72 = vmatpush.msra.mxu0 %v55_v6 }
  0x1a   :  { %73 = vmatpush.msra.mxu0 %v54_v7 }
  0x1c   :  { %74 = vmatpush.msra.mxu0 %v53_v8 }
  0x1e   :  { %75 = vmatpush.msra.mxu0 %v52_v9 }
  0x20   :  { %76 = vmatpush.msra.mxu0 %v51_v10 }
  0x22   :  { %77 = vmatpush.msra.mxu0 %v50_v11 }
  0x24   :  { %78 = vmatpush.msra.mxu0 %v49_v12 }
  0x26   :  { %79 = vmatpush.msra.mxu0 %v48_v13 }
  0x28   :  { %80 = vmatpush.msra.mxu0 %v47_v14 }
  0x2a   :  { %81 = vmatpush.msra.mxu0 %v46_v15 }
  0x2b   :  { %82 = vmatmul.f32.vlgmr.msra.gmra.mxu0 %v45_v16 }
  0xa8   :  { %v83_v18 = vpop.f32.mrf.mxu0 }
  0xa9   :  { %v84_v19 = vadd.f32 %v110_v17, %v83_v18 }
  0xab   :  { %86 = vst [vmem:[#allocation7] sm:$0xff] %v84_v19 }
  0xac   :  { %97 = dma.vmem_to_hbm [thread:$0]  %s93_s25, 128, %s95_s28, [#allocation4]  }
  0xad   :  { %187 = dma.done.wait [#allocation4], 128  }
  0xae   :  { %188 = vsyncadd [#allocation4], 4294967168 }
  0xaf   :  { %102 = vsyncpa [#allocation3], 1 }
  0xb0   :  { %103 = vsyncpa [#allocation6], 1 }
  0xb1   :  { %104 = vsyncpa [#allocation4], 1 }

</bundles_post_ra>
